<compile_context>
chip_gen: v7x
topology: tpu7x:2x2x1
jax: 0.10.0
libtpu: 0.0.40
codegen_flags: <defaults>
</compile_context>

<pallas_src>
import jax
import jax.numpy as jnp
import numpy as np
from jax.experimental import pallas as pl
from jax.experimental.pallas import tpu as pltpu

START_VALUE = -1000.0
END_VALUE = 300.0
_SCALE = 2.0 / (END_VALUE - START_VALUE)        # 2/1300
_OFFSET = -START_VALUE * _SCALE - 1.0           # fold (x - start)*s - 1 -> x*s + off

_LANES = 128


def init_kernel(w_ref, b_ref, x_ref, o_ref):
    # w_ref, b_ref: VMEM (C_out, 1)            (resident across the whole grid)
    # x_ref:        VMEM (NB, R, 128)          (sublane+lane dense spatial tile)
    # o_ref:        VMEM (NB, C_out, R, 128)
    y = jnp.clip(x_ref[...].astype(jnp.float32) * _SCALE + _OFFSET, -1.0, 1.0)
    wv = w_ref[...][None, :, :, None]            # (1, C_out, 1, 1)
    bv = b_ref[...][None, :, :, None]            # (1, C_out, 1, 1)
    o_ref[...] = (wv * y[:, None, :, :] + bv).astype(o_ref.dtype)


def initialization_forward(x, w, b, *, out_dtype=None, vmem_budget_frac=0.4):
    """x: (N, 1, H, W); w: (C_out,); b: (C_out,)  ->  (N, C_out, H, W)."""
    N, Cin, H, W = x.shape
    assert Cin == 1, "Initialization expects a single input channel"
    C_out = int(w.shape[0])
    out_dtype = jnp.dtype(out_dtype) if out_dtype is not None else x.dtype
    HW = H * W

    # ---- generation-aware VMEM budget (conservative default = v7x 64 MiB/TC) ----
    try:
        vmem_phys = int(pltpu.get_tpu_info().vmem_capacity_bytes)
    except Exception:
        vmem_phys = 64 << 20
    budget = int(vmem_phys * vmem_budget_frac)

    out_itemsize = jnp.dtype(out_dtype).itemsize
    # Live VMEM per grid step, per image-row (double-buffered input + output blocks).
    bytes_per_row_per_image = 2 * _LANES * (4 + C_out * out_itemsize)

    # ---- sublane + lane dense spatial layout: HW -> (rows, 128) ----
    rows = pl.cdiv(HW, _LANES)
    HW_lane_pad = rows * _LANES

    # ---- spatial (row) tiling: the biggest tile that fits the VMEM budget ----
    r_max = max(8, (budget // bytes_per_row_per_image) // 8 * 8)
    if rows <= r_max:
        r_tile, rows_pad = rows, rows
    else:
        # Prefer a multiple-of-8 tile that divides `rows` exactly so the large
        # output never needs a post-kernel slice (which would re-copy it all).
        r_tile = None
        start = (min(r_max, rows) // 8) * 8
        for cand in range(start, 7, -8):
            if rows % cand == 0:
                r_tile = cand
                break
        if r_tile is not None:
            rows_pad = rows
        else:
            r_tile = max(8, (r_max // 8) * 8)
            rows_pad = pl.cdiv(rows, r_tile) * r_tile
    spatial_tiles = rows_pad // r_tile

    # v7x: ensure >= 2 parallel grid steps so both TensorCores get work.
    if N == 1 and spatial_tiles == 1 and rows >= 16 and rows % 16 == 0:
        r_tile = rows // 2
        spatial_tiles = 2

    # ---- batch blocking: amortize per-step overhead when images are small ----
    nb = 1
    if spatial_tiles == 1 and N > 1:
        bytes_per_image = bytes_per_row_per_image * r_tile
        max_nb = max(1, budget // max(1, bytes_per_image))
        min_steps = 2  # keep both v7x TensorCores busy
        for cand in range(min(N, max_nb), 0, -1):
            if N % cand == 0 and (N // cand) >= min_steps:
                nb = cand
                break

    grid = (N // nb, spatial_tiles)

    # ---- reshape / (cheap, input-side only) padding ----
    x_flat = x.reshape(N, HW)
    if HW_lane_pad != HW:
        x_flat = jnp.pad(x_flat, ((0, 0), (0, HW_lane_pad - HW)))
    x3 = x_flat.reshape(N, rows, _LANES)
    if rows_pad != rows:
        x3 = jnp.pad(x3, ((0, 0), (0, rows_pad - rows), (0, 0)))

    w2 = w.reshape(C_out, 1).astype(jnp.float32)
    b2 = b.reshape(C_out, 1).astype(jnp.float32)

    live_bytes = (2 * nb * r_tile * _LANES * 4
                  + 2 * nb * C_out * r_tile * _LANES * out_itemsize
                  + 2 * C_out * _LANES * 4)
    vmem_limit = min(int(vmem_phys * 0.85), max(32 << 20, int(live_bytes * 1.6)))

    out4 = pl.pallas_call(
        init_kernel,
        out_shape=jax.ShapeDtypeStruct((N, C_out, rows_pad, _LANES), out_dtype),
        grid=grid,
        in_specs=[
            pl.BlockSpec((C_out, 1), lambda n, t: (0, 0)),            # w (resident)
            pl.BlockSpec((C_out, 1), lambda n, t: (0, 0)),            # b (resident)
            pl.BlockSpec((nb, r_tile, _LANES), lambda n, t: (n, t, 0)),
        ],
        out_specs=pl.BlockSpec((nb, C_out, r_tile, _LANES), lambda n, t: (n, 0, t, 0)),
        compiler_params=pltpu.CompilerParams(
            dimension_semantics=("parallel", "parallel"),
            vmem_limit_bytes=vmem_limit,
        ),
    )(w2, b2, x3)

    # Undo padding (no-op — and no extra HBM traffic — when HW % 128 == 0).
    out = out4
    if rows_pad != rows:
        out = out[:, :, :rows, :]
    out = out.reshape(N, C_out, rows * _LANES)
    if rows * _LANES != HW:
        out = out[:, :, :HW]
    return out.reshape(N, C_out, H, W)


def reference_forward(x, w, b):
    y = jnp.clip((x - START_VALUE) * _SCALE - 1.0, -1.0, 1.0)
    # 1x1 conv, 1 input channel: out[n,c,h,w] = w[c] * y[n,0,h,w] + b[c]
    return y * w[None, :, None, None] + b[None, :, None, None]


def _run_case(key, shape, c_out):
    kx, kw, kb = jax.random.split(key, 3)
    x = jax.random.uniform(kx, shape, jnp.float32, minval=-1500.0, maxval=800.0)
    w = jax.random.normal(kw, (c_out,), jnp.float32) * 0.5
    b = jax.random.normal(kb, (c_out,), jnp.float32) * 0.1

    out = jax.block_until_ready(initialization_forward(x, w, b))
    ref = reference_forward(x, w, b)

    assert out.shape == (shape[0], c_out, shape[2], shape[3])
    np.testing.assert_allclose(np.asarray(out), np.asarray(ref), rtol=1e-5, atol=1e-5)


if __name__ == "__main__":
    key = jax.random.PRNGKey(0)
    k0, k1, k2 = jax.random.split(key, 3)

    # Primary case from the module spec: N=2, 1 input channel, 16x16, C_out=4.
    _run_case(k0, (2, 1, 16, 16), 4)
    # HW not a multiple of 128 (exercises input-side lane padding + output trim).
    _run_case(k1, (2, 1, 40, 40), 4)
    # Many small images (exercises batch blocking per grid step).
    _run_case(k2, (8, 1, 8, 8), 4)

    print("KERNEL_OK")
</pallas_src>

<mosaic_0001>
module attributes {stable_mosaic.version = 11 : i64} {
  func.func @init_kernel(%arg0: i32, %arg1: i32, %arg2: memref<4x1xf32, #tpu.memory_space<vmem>>, %arg3: memref<4x1xf32, #tpu.memory_space<vmem>>, %arg4: memref<1x2x128xf32, #tpu.memory_space<vmem>>, %arg5: memref<1x4x2x128xf32, #tpu.memory_space<vmem>>) attributes {dimension_semantics = [#tpu.dimension_semantics<parallel>, #tpu.dimension_semantics<parallel>], iteration_bounds = array<i64: 2, 1>, scalar_prefetch = 0 : i64, scratch_operands = 0 : i64, tpu.core_type = #tpu.core_type<tc>, window_params = [{pipeline_mode = #tpu.pipeline_mode<synchronous>, transform_indices = @transform_0, window_bounds = array<i64: 4, 1>}, {pipeline_mode = #tpu.pipeline_mode<synchronous>, transform_indices = @transform_1, window_bounds = array<i64: 4, 1>}, {transform_indices = @transform_2, window_bounds = array<i64: 1, 2, 128>}, {transform_indices = @transform_3, window_bounds = array<i64: 1, 4, 2, 128>}]} {
    %c0 = arith.constant 0 : index
    %c0_0 = arith.constant 0 : index
    %c0_1 = arith.constant 0 : index
    %0 = vector.load %arg4[%c0, %c0_0, %c0_1] : memref<1x2x128xf32, #tpu.memory_space<vmem>>, vector<1x2x128xf32>
    %cst = arith.constant 0.00153846154 : f32
    %1 = vector.broadcast %cst : f32 to vector<1x2x128xf32>
    %2 = arith.mulf %0, %1 : vector<1x2x128xf32>
    %cst_2 = arith.constant 0.538461566 : f32
    %3 = vector.broadcast %cst_2 : f32 to vector<1x2x128xf32>
    %4 = arith.addf %2, %3 : vector<1x2x128xf32>
    %cst_3 = arith.constant -1.000000e+00 : f32
    %cst_4 = arith.constant 1.000000e+00 : f32
    %5 = vector.broadcast %cst_3 : f32 to vector<1x2x128xf32>
    %6 = arith.maximumf %5, %4 : vector<1x2x128xf32>
    %7 = vector.broadcast %cst_4 : f32 to vector<1x2x128xf32>
    %8 = arith.minimumf %7, %6 : vector<1x2x128xf32>
    %c0_5 = arith.constant 0 : index
    %c0_6 = arith.constant 0 : index
    %9 = vector.load %arg2[%c0_5, %c0_6] : memref<4x1xf32, #tpu.memory_space<vmem>>, vector<4x1xf32>
    %10 = vector.shape_cast %9 : vector<4x1xf32> to vector<1x4x1x1xf32>
    %c0_7 = arith.constant 0 : index
    %c0_8 = arith.constant 0 : index
    %11 = vector.load %arg3[%c0_7, %c0_8] : memref<4x1xf32, #tpu.memory_space<vmem>>, vector<4x1xf32>
    %12 = vector.shape_cast %11 : vector<4x1xf32> to vector<1x4x1x1xf32>
    %13 = vector.shape_cast %8 : vector<1x2x128xf32> to vector<1x1x2x128xf32>
    %14 = vector.broadcast %10 : vector<1x4x1x1xf32> to vector<1x4x2x128xf32>
    %15 = vector.broadcast %13 : vector<1x1x2x128xf32> to vector<1x4x2x128xf32>
    %16 = arith.mulf %14, %15 : vector<1x4x2x128xf32>
    %17 = vector.broadcast %12 : vector<1x4x1x1xf32> to vector<1x4x2x128xf32>
    %18 = arith.addf %16, %17 : vector<1x4x2x128xf32>
    %c0_9 = arith.constant 0 : index
    %c0_10 = arith.constant 0 : index
    %c0_11 = arith.constant 0 : index
    %c0_12 = arith.constant 0 : index
    %19 = vector.load %arg5[%c0_9, %c0_10, %c0_11, %c0_12] : memref<1x4x2x128xf32, #tpu.memory_space<vmem>>, vector<1x4x2x128xf32>
    tpu.vector_store %arg5[%c0_9, %c0_10, %c0_11, %c0_12], %18 {strides = array<i32>} : memref<1x4x2x128xf32, #tpu.memory_space<vmem>>, vector<1x4x2x128xf32>,
    return
  }
  func.func @transform_0(%arg0: i32, %arg1: i32) -> (i32, i32) {
    %c0_i32 = arith.constant 0 : i32
    %c0_i32_0 = arith.constant 0 : i32
    %c0_i32_1 = arith.constant 0 : i32
    return %c0_i32, %c0_i32_0 : i32, i32
  }
  func.func @transform_1(%arg0: i32, %arg1: i32) -> (i32, i32) {
    %c0_i32 = arith.constant 0 : i32
    %c0_i32_0 = arith.constant 0 : i32
    %c0_i32_1 = arith.constant 0 : i32
    return %c0_i32, %c0_i32_0 : i32, i32
  }
  func.func @transform_2(%arg0: i32, %arg1: i32) -> (i32, i32, i32) {
    %c0_i32 = arith.constant 0 : i32
    %c0_i32_0 = arith.constant 0 : i32
    return %arg0, %arg1, %c0_i32 : i32, i32, i32
  }
  func.func @transform_3(%arg0: i32, %arg1: i32) -> (i32, i32, i32, i32) {
    %c0_i32 = arith.constant 0 : i32
    %c0_i32_0 = arith.constant 0 : i32
    %c0_i32_1 = arith.constant 0 : i32
    return %arg0, %c0_i32, %arg1, %c0_i32_0 : i32, i32, i32, i32
  }
}

</mosaic_0001>

<bundles_post_ra>
// kernel: tpu_custom_call.1
= control target key start
LH: loop header
LB: loop body
LE: loop exit
PB: predicated region body
PF: predicated region fallthrough
CT: control target
= control target key end

     0   :  { %8 = vsyncpa [#allocation3], 0  ;;  %s717_s0 = inlined_call_operand.vmem [shape: f32[4,1], index: 0, kind: input, shape index: {}]   ;;  %s718_s1 = inlined_call_operand.vmem [shape: f32[4,1], index: 1, kind: input, shape index: {}]   ;;  %s719_s2 = inlined_call_operand.vmem [shape: f32[2,2,128], index: 2, kind: input, shape index: {}]   ;;  %s720_s3 = inlined_call_operand.hbm [shape: f32[2,4,2,128], index: 3, kind: output, shape index: {}]  }
   0x1   :  { %10 = vsyncpa [#allocation3 + $0x1], 0  ;;  %s596_s12 = smov 0   ;;  %s598_s13 = smov 0  }
   0x2   :  { %s600_s14 = smov 0   ;;  %s602_s15 = smov 0  }
   0x3   :  { %s604_s16 = smov 0   ;;  %s606_s17 = smov 0  }
   0x4 LB: > { %s414_s18 = sadd.s32 4294967295, %s569_s17   ;;  %s415_s19 = sadd.s32 4294967294, %s569_s17   ;;  %s569_s17 = sphi %s606_s17, %s16_s17   ;;  %s565_s16 = sphi %s604_s16, %s727_s16   ;;  %s561_s15 = sphi %s602_s15, %s726_s15   ;;  %s557_s14 = sphi %s600_s14, %s725_s14   ;;  %s553_s13 = sphi %s598_s13, %s724_s13   ;;  %s549_s12 = sphi %s596_s12, %s723_s12  }
   0x5   : > { %s28_s20 = sadd.s32 1, %s565_s16  ;;  %s107_s21 = sadd.s32 1, %s557_s14 }
   0x6   : > { %p30_p0 = scmp.ge.s32.totalorder %s28_s20, 2  ;;  %p117_p1 = scmp.ne.s32.totalorder %s557_s14, %s553_s13 }
   0x7   : > { %p118_p2 = scmp.eq.s32.totalorder %s414_s18, 1  ;;  %p123_p3 = scmp.ne.s32.totalorder %s553_s13, %s549_s12 }
   0x8   : > { %s729_s20 = smov (%p30_p0, %s28_s20), 0  ;;  %p124_p5 = scmp.eq.s32.totalorder %s415_s19, 1 }
   0x9   : > { %p636_p4 = por %p118_p2, %p117_p1  ;;  %s102_s23 = ssub.s32 %s565_s16, %s729_s20 }
   0xa   : > { %p418_p6 = scmp.ge.s32.totalorder %s569_s17, 1  ;;  %p105_p7 = scmp.eq.s32.totalorder %s102_s23, 0 }
   0xb   : > { %p643_p8 = por %p124_p5, %p123_p3  ;;  %p158_p9 = scmp.lt.s32.totalorder %s569_s17, 3 }
   0xc   : > { %s649_s25 = scalar_select %p105_p7, %s557_s14, %s107_s21  }
   0xd   : > { %p159_p10 = pnand %p418_p6, %p158_p9 }
   0xe   : > { %v209_v0 = vlaneseq (!%p159_p10)  ;;  %v571_v1 = vmov (!%p159_p10), 0   ;;  %v572_v2 = vmov (!%p159_p10), 1966171168   ;;  %p184_p11 = scmp.lt.s32.totalorder (!%p159_p10), %s561_s15, 1  ;;  %s181_s8 = sand.u32 (!%p159_p10), 1, %s553_s13  }
   0xf   : > { %162 = sbr.rel (%p159_p10) target bundleno = 182 (0xb6), region = 32  ;;  %490 = vset.pattern.permute.xlu1 (!%p159_p10), %v571_v1  ;;  %489 = vset.pattern.permute.xlu0 (!%p159_p10), %v571_v1  ;;  %v207_v3 = vunpack.c.l.s4 (!%p159_p10), %v572_v2  ;;  %v423_v4 = vld.sshfl [vmem:[%s718_s1] sm:$0x33 pattern:$0x75316420] (!%p159_p10)  ;;  %s419_s9 = sshll.u32 (!%p159_p10), %s181_s8, 3 }
  0x10   : > { %v210_v5 = vshrl.u32 (!%p159_p10), %v209_v0, 7  ;;  %v422_v6 = vld.sshfl [vmem:[%s717_s0] sm:$0x33 pattern:$0x75316420] (!%p159_p10)  ;;  %v231_v8 = vcombine.high (!%p159_p10), %v423_v4, %v423_v4  ;;  %s183_s10 = scalar_lea.vmem (!%p159_p10), [#allocation2], %s419_s9 }
  0x11   : > { %v208_v7 = vunpack.c.0.s8 (!%p159_p10), %v207_v3  ;;  %v205_v9 = vcombine.high (!%p159_p10), %v422_v6, %v422_v6  ;;  %s339_s11 = sshll.u32 (!%p159_p10), %s183_s10, 4  ;;  %s429_s18 = sshll.u32 (!%p159_p10), %s561_s15, 7  ;;  %s664_s11 = int_to_ptr.vmem [resolvable:$true] %s339_s11 }
  0x12   : > { %v250_v11 = vsub.s32 (!%p159_p10), 0, %v210_v5  ;;  %s669_s23 = scalar_lea.hbm (!%p159_p10), %s720_s3, %s429_s18  ;;  %s491_s26 = scalar_lea.vmem (!%p159_p10), %s664_s11, 128 }
  0x13   : > { %v211_v10 = vsub.s32 (!%p159_p10), %v208_v7, %v210_v5  ;;  %p492_p12 = scmp.ne.s32.totalorder (!%p159_p10), %s664_s11, %s491_s26  ;;  %s573_s27 = smov (!%p159_p10), [#allocation2]  }
  0x14   : > { %s495_s28 = sshll.u32 (!%p159_p10), %s573_s27, 4  ;;  %s496_s28 = int_to_ptr.vmem [resolvable:$false] %s495_s28 }
  0x15   : > { %v245_v12 = vrot.slane (!%p159_p10), %v231_v8, %v211_v10  ;;  %v212_v13 = vrot.slane (!%p159_p10), %v422_v6, %v211_v10  ;;  %v219_v14 = vrot.slane (!%p159_p10), %v205_v9, %v211_v10  ;;  %v238_v18 = vrot.slane (!%p159_p10), %v423_v4, %v211_v10  ;;  %p493_p13 = pnand (!%p159_p10), %p492_p12, %p636_p4  ;;  %s497_s29 = scalar_lea.vmem (!%p159_p10), %s496_s28, 256 }
  0x16   : > { %s185_s30 = scalar_select %p184_p11, %s561_s15, 1 }
  0x17   : > { %v291_v15 = vrot.slane %v245_v12, %v250_v11  ;;  %v251_v16 = vrot.slane %v212_v13, %v250_v11  ;;  %v220_v17 = vcombine.high %v212_v13, %v212_v13  ;;  %v255_v20 = vrot.slane %v219_v14, %v250_v11  ;;  %s671_s15 = scalar_lea.sflag [#allocation3], %s181_s8  ;;  %p494_p0 = pneg %p493_p13 }
  0x18   : > { %v221_v21 = vcombine.high %v219_v14, %v219_v14  ;;  %v247_v22 = vcombine.high %v245_v12, %v245_v12  ;;  %v287_v23 = vrot.slane %v238_v18, %v250_v11  ;;  %v246_v25 = vcombine.high %v238_v18, %v238_v18  ;;  %s420_s4 = sshll.u32 %s185_s30, 1  ;;  %p498_p1 = scmp.lt.s32.totalorder %s664_s11, %s496_s28 }
  0x19   : > { %305 = vperm.xlu1 %490, %v291_v15   ;;  %265 = vperm.xlu0 %489, %v251_v16   ;;  %v259_v19 = vrot.slane %v220_v17, %v250_v11  ;;  %s190_s7 = scalar_lea.vmem %s719_s2, %s420_s4  ;;  %p499_p2 = scmp.lt.s32.totalorder %s497_s29, %s491_s26 }
  0x1a   : > { %v263_v24 = vrot.slane %v221_v21, %v250_v11  ;;  %v295_v26 = vrot.slane %v246_v25, %v250_v11  ;;  %v299_v27 = vrot.slane %v247_v22, %v250_v11  ;;  %v191_v28 = vld [vmem:[%s190_s7] sm:$0x3] }
  0x1b   : > { %v192_v29 = vmul.f32 0.0015384615, %v191_v28  ;;  %p500_p3 = por %p499_p2, %p498_p1 }
  0x1d   : > { %273 = vperm.xlu1 %490, %v259_v19   ;;  %269 = vperm.xlu0 %489, %v255_v20   ;;  %v193_v30 = vadd.f32 0.53846157, %v192_v29  ;;  %p501_p5 = pnand %p500_p3, %p494_p0 }
  0x1f   : > { %v421_v33 = vclamps-f32 %v193_v30, 1.0 }
  0x21   : > { %301 = vperm.xlu0 %489, %v287_v23   ;;  %277 = vperm.xlu1 %490, %v263_v24  }
  0x25   : > { %309 = vperm.xlu0 %489, %v295_v26   ;;  %313 = vperm.xlu1 %490, %v299_v27  }
  0x98   : > { %v306_v31 = vpop.permute.xlu1 %305  ;;  %v266_v32 = vpop.permute.xlu0 %265 }
  0x99   : > { %v280_v37 = vmul.f32 %v421_v33, %v266_v32 }
  0x9c   : > { %v274_v34 = vpop.permute.xlu1 %273  ;;  %v270_v35 = vpop.permute.xlu0 %269 }
  0x9d   : > { %v281_v36 = vmul.f32 %v421_v33, %v270_v35  ;;  %v282_v42 = vmul.f32 %v421_v33, %v274_v34 }
  0x9f   : > { %v317_v38 = vadd.f32 %v306_v31, %v281_v36 }
  0xa0   : > { %v302_v39 = vpop.permute.xlu0 %301  ;;  %v278_v40 = vpop.permute.xlu1 %277 }
  0xa1   : > { %321 = vst [vmem:[%s183_s10 + $0x2] sm:$0x3] %v317_v38  ;;  %v316_v41 = vadd.f32 %v302_v39, %v280_v37  ;;  %v283_v43 = vmul.f32 %v421_v33, %v278_v40 }
  0xa3   : > { %320 = vst [vmem:[%s183_s10] sm:$0x3] %v316_v41 }
  0xa4   : > { %v310_v44 = vpop.permute.xlu0 %309  ;;  %v314_v45 = vpop.permute.xlu1 %313 }
  0xa5   : > { %v318_v46 = vadd.f32 %v310_v44, %v282_v42  ;;  %v319_v47 = vadd.f32 %v314_v45, %v283_v43 }
  0xa7   : > { %322 = vst [vmem:[%s183_s10 + $0x4] sm:$0x3] %v318_v46  ;;  %323 = vst [vmem:[%s183_s10 + $0x6] sm:$0x3] %v319_v47 }
  0xa8   : > { %504 = shalt.err (!%p501_p5)
}
  0xa9   : > { %s505_s30 = scalar_lea.hbm %s669_s23, 128  ;;  %s509_s6 = scalar_lea.hbm %s720_s3, 256 }
  0xaa   : > { %p506_p6 = scmp.ne.s32.totalorder %s669_s23, %s505_s30  ;;  %p510_p10 = scmp.lt.u32.totalorder %s669_s23, %s720_s3 }
  0xab   : > { %p511_p11 = scmp.lt.u32.totalorder %s509_s6, %s505_s30  ;;  %p513_p13 = scmp.lt.u32.totalorder %s505_s30, %s669_s23 }
  0xac   : > { %p507_p7 = pnand %p506_p6, %p636_p4 }
  0xad   : > { %p512_p12 = por %p511_p11, %p510_p10 }
  0xae   : > { %p508_p9 = pneg %p507_p7 }
  0xaf   : > { %p514_p0 = por %p513_p13, %p512_p12 }
  0xb1   : > { %p515_p1 = pnand %p514_p0, %p508_p9 }
  0xb3   : > { %518 = shalt.err (!%p515_p1)
}
  0xb4   : > { %s574_s9 = smov 32   ;;  %s575_s10 = smov 2  }
  0xb5   : > { %430 = dma.vmem_to_hbm [thread:$0]  (%p636_p4), %s664_s11, 128, %s669_s23, %s671_s15, %s574_s9, %s574_s9, %s575_s10  }
  0xb6 PF: > { %p436_p2 = scmp.ge.s32.totalorder %s569_s17, 2  ;;  %s354_s18 = sand.u32 1, %s549_s12  }
  0xb7   : > { %s355_s19 = scalar_lea.sflag [#allocation3], %s354_s18 }
  0xb8   : > { %p433_p3 = pnand %p436_p2, %p643_p8 }
  0xba   : > { %544 = dma.done.wait (!%p433_p3), %s355_s19, 128  }
  0xbb   : > { %546 = vsyncadd (!%p433_p3), %s355_s19, 4294967168  ;;  %s16_s17 = sadd.s32 1, %s569_s17   ;;  %s723_s12 = smov %s553_s13 }
  0xbc   : > { %p13_p5 = scmp.ge.s32.totalorder %s16_s17, 4   ;;  %s724_s13 = smov %s557_s14 }
  0xbd   : > { %s725_s14 = smov %s649_s25  ;;  %s726_s15 = smov %s565_s16 }
  0xbe   : > { %s727_s16 = smov %s729_s20  ;;  %15 = sbr.rel (!%p13_p5) target bundleno = 4 (0x4), region = 67 }
  0xc5   :  { %360 = vsyncpa [#allocation3], 1 }
  0xc6   :  { %362 = vsyncpa [#allocation3 + $0x1], 1 }

</bundles_post_ra>
